<compile_context>
chip_gen: v7x
topology: tpu7x:2x2x1
jax: 0.10.0
libtpu: 0.0.40
codegen_flags: <defaults>
</compile_context>

<pallas_src>
import functools

import jax
import jax.numpy as jnp
from jax.experimental import pallas as pl
from jax.experimental.pallas import tpu as pltpu

LANE = 128
NUM_CLASSES = 10
HIDDEN0 = 100
HIDDEN1 = 50


def _round_up(x, m):
    return (x + m - 1) // m * m


def _mlp_kernel(x_ref, w0_ref, b0_ref, w1_ref, b1_ref, w2_ref, b2_ref, o_ref):
    # Cast the x tile to bf16 in-kernel (VPU work hidden under DMA) so the
    # wrapper never materializes a padded / cast copy of x in HBM.
    x = x_ref[...].astype(jnp.bfloat16)

    # fc0 + ReLU (bf16 MXU inputs, f32 accumulate)
    h0 = jnp.dot(x, w0_ref[...], preferred_element_type=jnp.float32)
    h0 = jnp.maximum(h0 + b0_ref[...], 0.0)

    # fc1 + ReLU
    h1 = jnp.dot(h0.astype(jnp.bfloat16), w1_ref[...],
                 preferred_element_type=jnp.float32)
    h1 = jnp.maximum(h1 + b1_ref[...], 0.0)

    # fc2
    logits = jnp.dot(h1.astype(jnp.bfloat16), w2_ref[...],
                     preferred_element_type=jnp.float32)
    logits = logits + b2_ref[...]

    # log_softmax over the 10 real classes; lanes >= 10 are zero-padded weights
    # and are masked to a huge negative so exp() kills them (no transient inf).
    lane = jax.lax.broadcasted_iota(jnp.int32, logits.shape, 1)
    valid = lane < NUM_CLASSES
    masked = jnp.where(valid, logits, jnp.float32(-1e30))
    m = jnp.max(masked, axis=-1, keepdims=True)
    shifted = masked - m                      # padded lanes -> -1e30, exp -> 0
    sumexp = jnp.sum(jnp.exp(shifted), axis=-1, keepdims=True)
    lse = jnp.log(sumexp)
    o_ref[...] = jnp.where(valid, shifted - lse, 0.0).astype(o_ref.dtype)


def _pick_tile_n(n, image_size, out_bytes):
    """VMEM-budget-derived batch tile (multiple of 8 f32 sublanes)."""
    # Resident weights / biases (budget 2x for pipeline double-buffering).
    weight_bytes = 2 * (image_size * LANE * 2 + 2 * LANE * LANE * 2
                        + 3 * LANE * 4)
    # Streaming cost per batch row: x (f32, 2 buffers) + output (2 buffers).
    per_row = 2 * image_size * 4 + 2 * LANE * out_bytes
    budget = 24 * 1024 * 1024          # headroom inside the 32 MiB scoped limit
    cap = max(64, min(1024, (budget - weight_bytes) // per_row // 8 * 8))
    # Keep >= 2 grid steps once the batch is non-trivial so the "parallel"
    # batch axis actually shards across v7x's two TensorCores.
    if n >= 256:
        cap = min(cap, max(8, _round_up(-(-n // 2), 8)))
    return min(cap, _round_up(n, 8))


@functools.partial(jax.jit, static_argnames=("image_size", "out_dtype"))
def neural_network_a_forward(x, params, *, image_size, out_dtype=jnp.float32):
    """x: any shape whose trailing elements flatten to image_size per row."""
    w0, b0, w1, b1, w2, b2 = params

    x2d = x.reshape(-1, image_size)
    n = x2d.shape[0]

    out_bytes = jnp.dtype(out_dtype).itemsize
    tile_n = _pick_tile_n(n, image_size, out_bytes)
    grid = (pl.cdiv(n, tile_n),)

    flops = 2 * n * (image_size * LANE + 2 * LANE * LANE)
    transcendentals = n * (LANE + 1)
    bytes_accessed = (
        n * image_size * x2d.dtype.itemsize            # x streamed as-is
        + (image_size * LANE + 2 * LANE * LANE) * 2    # bf16 weights
        + 3 * LANE * 4                                 # f32 biases
        + n * LANE * out_bytes                         # output
    )

    out = pl.pallas_call(
        _mlp_kernel,
        out_shape=jax.ShapeDtypeStruct((n, LANE), out_dtype),
        grid=grid,
        in_specs=[
            pl.BlockSpec((tile_n, image_size), lambda i: (i, 0)),  # x tile
            pl.BlockSpec((image_size, LANE), lambda i: (0, 0)),    # w0 resident
            pl.BlockSpec((1, LANE), lambda i: (0, 0)),             # b0
            pl.BlockSpec((LANE, LANE), lambda i: (0, 0)),          # w1
            pl.BlockSpec((1, LANE), lambda i: (0, 0)),             # b1
            pl.BlockSpec((LANE, LANE), lambda i: (0, 0)),          # w2
            pl.BlockSpec((1, LANE), lambda i: (0, 0)),             # b2
        ],
        out_specs=pl.BlockSpec((tile_n, LANE), lambda i: (i, 0)),
        compiler_params=pltpu.CompilerParams(
            dimension_semantics=("parallel",),
            vmem_limit_bytes=32 * 1024 * 1024,
        ),
        cost_estimate=pl.CostEstimate(
            flops=flops,
            transcendentals=transcendentals,
            bytes_accessed=bytes_accessed,
        ),
    )(x2d, w0, b0, w1, b1, w2, b2)

    return out[:, :NUM_CLASSES]


def init_params(image_size, key):
    """Deterministic init matching nn.Linear shapes, lane-padded + bf16 weights.

    w0: (image_size, 128) bf16 — contraction dim UNPADDED so x needs no column
        padding; output lanes beyond the real fan_out are zero.
    w1, w2: (128, 128) bf16, zero-padded beyond real fan_in / fan_out.
    Biases: (1, 128) f32, zero-padded beyond the real fan_out.
    """
    keys = jax.random.split(key, 6)

    def lin(kw, kb, fan_in, fan_out, in_pad, out_pad):
        bound = 1.0 / jnp.sqrt(jnp.float32(fan_in))
        w = jax.random.uniform(kw, (fan_in, fan_out), jnp.float32, -bound, bound)
        b = jax.random.uniform(kb, (fan_out,), jnp.float32, -bound, bound)
        w_p = jnp.zeros((in_pad, out_pad), jnp.float32).at[:fan_in, :fan_out].set(w)
        b_p = jnp.zeros((1, out_pad), jnp.float32).at[0, :fan_out].set(b)
        return w_p.astype(jnp.bfloat16), b_p

    w0, b0 = lin(keys[0], keys[1], image_size, HIDDEN0, image_size, LANE)
    w1, b1 = lin(keys[2], keys[3], HIDDEN0, HIDDEN1, LANE, LANE)
    w2, b2 = lin(keys[4], keys[5], HIDDEN1, NUM_CLASSES, LANE, LANE)
    return (w0, b0, w1, b1, w2, b2)


def reference_forward(x, params, image_size):
    """Plain-JAX reference with the same bf16-input / f32-accumulate math."""
    w0, b0, w1, b1, w2, b2 = params
    x2d = x.reshape(-1, image_size).astype(jnp.bfloat16)
    h0 = jnp.maximum(
        jnp.dot(x2d, w0, preferred_element_type=jnp.float32) + b0, 0.0)
    h1 = jnp.maximum(
        jnp.dot(h0.astype(jnp.bfloat16), w1,
                preferred_element_type=jnp.float32) + b1, 0.0)
    logits = jnp.dot(h1.astype(jnp.bfloat16), w2,
                     preferred_element_type=jnp.float32) + b2
    return jax.nn.log_softmax(logits[:, :NUM_CLASSES], axis=-1)


if __name__ == "__main__":
    key = jax.random.PRNGKey(0)
    kx, kp = jax.random.split(key)

    # Small NCHW input: batch=8, channels=1, 16x16 -> image_size = 256.
    N, C, H, W = 8, 1, 16, 16
    image_size = C * H * W
    x = jax.random.normal(kx, (N, C, H, W), jnp.float32)

    params = init_params(image_size, kp)

    out = neural_network_a_forward(x, params, image_size=image_size)
    out = jax.block_until_ready(out)

    ref = reference_forward(x, params, image_size)
    assert out.shape == (N, NUM_CLASSES)
    assert jnp.allclose(out, ref, atol=1e-4, rtol=1e-4), (
        float(jnp.max(jnp.abs(out - ref))))

    # Ragged-batch path (n not a multiple of the tile): handled by Pallas
    # partial-block padding, no wrapper-side row padding.
    N2 = 11
    x2 = jax.random.normal(kx, (N2, C, H, W), jnp.float32)
    out2 = jax.block_until_ready(
        neural_network_a_forward(x2, params, image_size=image_size))
    ref2 = reference_forward(x2, params, image_size)
    assert out2.shape == (N2, NUM_CLASSES)
    assert jnp.allclose(out2, ref2, atol=1e-4, rtol=1e-4)

    # Optional halved-writeback path (bf16 log-probs), looser tolerance.
    out_bf16 = jax.block_until_ready(
        neural_network_a_forward(x, params, image_size=image_size,
                                 out_dtype=jnp.bfloat16))
    assert jnp.allclose(out_bf16.astype(jnp.float32), ref, atol=5e-2, rtol=5e-2)

    print("KERNEL_OK")
</pallas_src>

<mosaic_0001>
module attributes {stable_mosaic.version = 11 : i64} {
  func.func @_mlp_kernel(%arg0: i32, %arg1: memref<8x256xf32, #tpu.memory_space<vmem>>, %arg2: memref<256x128xbf16, #tpu.memory_space<vmem>>, %arg3: memref<1x128xf32, #tpu.memory_space<vmem>>, %arg4: memref<128x128xbf16, #tpu.memory_space<vmem>>, %arg5: memref<1x128xf32, #tpu.memory_space<vmem>>, %arg6: memref<128x128xbf16, #tpu.memory_space<vmem>>, %arg7: memref<1x128xf32, #tpu.memory_space<vmem>>, %arg8: memref<8x128xf32, #tpu.memory_space<vmem>>) attributes {dimension_semantics = [#tpu.dimension_semantics<parallel>], iteration_bounds = array<i64: 1>, scalar_prefetch = 0 : i64, scratch_operands = 0 : i64, tpu.core_type = #tpu.core_type<tc>, window_params = [{transform_indices = @transform_0, window_bounds = array<i64: 8, 256>}, {pipeline_mode = #tpu.pipeline_mode<synchronous>, transform_indices = @transform_1, window_bounds = array<i64: 256, 128>}, {pipeline_mode = #tpu.pipeline_mode<synchronous>, transform_indices = @transform_2, window_bounds = array<i64: 1, 128>}, {pipeline_mode = #tpu.pipeline_mode<synchronous>, transform_indices = @transform_3, window_bounds = array<i64: 128, 128>}, {pipeline_mode = #tpu.pipeline_mode<synchronous>, transform_indices = @transform_4, window_bounds = array<i64: 1, 128>}, {pipeline_mode = #tpu.pipeline_mode<synchronous>, transform_indices = @transform_5, window_bounds = array<i64: 128, 128>}, {pipeline_mode = #tpu.pipeline_mode<synchronous>, transform_indices = @transform_6, window_bounds = array<i64: 1, 128>}, {transform_indices = @transform_7, window_bounds = array<i64: 8, 128>}]} {
    %c0 = arith.constant 0 : index
    %c0_0 = arith.constant 0 : index
    %0 = vector.load %arg1[%c0, %c0_0] : memref<8x256xf32, #tpu.memory_space<vmem>>, vector<8x256xf32>
    %1 = arith.truncf %0 : vector<8x256xf32> to vector<8x256xbf16>
    %c0_1 = arith.constant 0 : index
    %c0_2 = arith.constant 0 : index
    %2 = vector.load %arg2[%c0_1, %c0_2] : memref<256x128xbf16, #tpu.memory_space<vmem>>, vector<256x128xbf16>
    %cst = arith.constant dense<0.000000e+00> : vector<8x128xf32>
    %3 = tpu.matmul %1, %2, %cst {dimension_numbers = #tpu.dot_dimension_numbers<[1], [0], [0], [1], [0, 0, 1, 1], [], []>} : vector<8x256xbf16>, vector<256x128xbf16>, vector<8x128xf32> -> vector<8x128xf32>
    %c0_3 = arith.constant 0 : index
    %c0_4 = arith.constant 0 : index
    %4 = vector.load %arg3[%c0_3, %c0_4] : memref<1x128xf32, #tpu.memory_space<vmem>>, vector<1x128xf32>
    %5 = vector.broadcast %4 : vector<1x128xf32> to vector<8x128xf32>
    %6 = arith.addf %3, %5 : vector<8x128xf32>
    %cst_5 = arith.constant 0.000000e+00 : f32
    %7 = vector.broadcast %cst_5 : f32 to vector<8x128xf32>
    %8 = arith.maximumf %6, %7 : vector<8x128xf32>
    %9 = arith.truncf %8 : vector<8x128xf32> to vector<8x128xbf16>
    %c0_6 = arith.constant 0 : index
    %c0_7 = arith.constant 0 : index
    %10 = vector.load %arg4[%c0_6, %c0_7] : memref<128x128xbf16, #tpu.memory_space<vmem>>, vector<128x128xbf16>
    %cst_8 = arith.constant dense<0.000000e+00> : vector<8x128xf32>
    %11 = tpu.matmul %9, %10, %cst_8 {dimension_numbers = #tpu.dot_dimension_numbers<[1], [0], [0], [1], [0, 0, 1, 1], [], []>} : vector<8x128xbf16>, vector<128x128xbf16>, vector<8x128xf32> -> vector<8x128xf32>
    %c0_9 = arith.constant 0 : index
    %c0_10 = arith.constant 0 : index
    %12 = vector.load %arg5[%c0_9, %c0_10] : memref<1x128xf32, #tpu.memory_space<vmem>>, vector<1x128xf32>
    %13 = vector.broadcast %12 : vector<1x128xf32> to vector<8x128xf32>
    %14 = arith.addf %11, %13 : vector<8x128xf32>
    %cst_11 = arith.constant 0.000000e+00 : f32
    %15 = vector.broadcast %cst_11 : f32 to vector<8x128xf32>
    %16 = arith.maximumf %14, %15 : vector<8x128xf32>
    %17 = arith.truncf %16 : vector<8x128xf32> to vector<8x128xbf16>
    %c0_12 = arith.constant 0 : index
    %c0_13 = arith.constant 0 : index
    %18 = vector.load %arg6[%c0_12, %c0_13] : memref<128x128xbf16, #tpu.memory_space<vmem>>, vector<128x128xbf16>
    %cst_14 = arith.constant dense<0.000000e+00> : vector<8x128xf32>
    %19 = tpu.matmul %17, %18, %cst_14 {dimension_numbers = #tpu.dot_dimension_numbers<[1], [0], [0], [1], [0, 0, 1, 1], [], []>} : vector<8x128xbf16>, vector<128x128xbf16>, vector<8x128xf32> -> vector<8x128xf32>
    %c0_15 = arith.constant 0 : index
    %c0_16 = arith.constant 0 : index
    %20 = vector.load %arg7[%c0_15, %c0_16] : memref<1x128xf32, #tpu.memory_space<vmem>>, vector<1x128xf32>
    %21 = vector.broadcast %20 : vector<1x128xf32> to vector<8x128xf32>
    %22 = arith.addf %19, %21 : vector<8x128xf32>
    %23 = tpu.iota {dimensions = array<i32: 1>} : vector<8x128xi32>
    %c10_i32 = arith.constant 10 : i32
    %24 = vector.broadcast %c10_i32 : i32 to vector<8x128xi32>
    %25 = arith.cmpi slt, %23, %24 : vector<8x128xi32>
    %cst_17 = arith.constant -1.000000e+30 : f32
    %26 = vector.broadcast %cst_17 : f32 to vector<8x128xf32>
    %27 = arith.select %25, %22, %26 : vector<8x128xi1>, vector<8x128xf32>
    %cst_18 = arith.constant dense<0xFF800000> : vector<8xf32>
    %28 = vector.multi_reduction <maximumf>, %27, %cst_18 [1] : vector<8x128xf32> to vector<8xf32>
    %29 = vector.shape_cast %28 : vector<8xf32> to vector<8x1xf32>
    %30 = vector.broadcast %29 : vector<8x1xf32> to vector<8x128xf32>
    %31 = arith.subf %27, %30 : vector<8x128xf32>
    %32 = math.exp %31 : vector<8x128xf32>
    %cst_19 = arith.constant dense<0.000000e+00> : vector<8xf32>
    %33 = vector.multi_reduction <add>, %32, %cst_19 [1] : vector<8x128xf32> to vector<8xf32>
    %34 = vector.shape_cast %33 : vector<8xf32> to vector<8x1xf32>
    %35 = math.log %34 : vector<8x1xf32>
    %36 = vector.broadcast %35 : vector<8x1xf32> to vector<8x128xf32>
    %37 = arith.subf %31, %36 : vector<8x128xf32>
    %cst_20 = arith.constant 0.000000e+00 : f32
    %38 = vector.broadcast %cst_20 : f32 to vector<8x128xf32>
    %39 = arith.select %25, %37, %38 : vector<8x128xi1>, vector<8x128xf32>
    %c0_21 = arith.constant 0 : index
    %c0_22 = arith.constant 0 : index
    %40 = vector.load %arg8[%c0_21, %c0_22] : memref<8x128xf32, #tpu.memory_space<vmem>>, vector<8x128xf32>
    tpu.vector_store %arg8[%c0_21, %c0_22], %39 {strides = array<i32>} : memref<8x128xf32, #tpu.memory_space<vmem>>, vector<8x128xf32>,
    return
  }
  func.func @transform_0(%arg0: i32) -> (i32, i32) {
    %c0_i32 = arith.constant 0 : i32
    %c0_i32_0 = arith.constant 0 : i32
    return %arg0, %c0_i32 : i32, i32
  }
  func.func @transform_1(%arg0: i32) -> (i32, i32) {
    %c0_i32 = arith.constant 0 : i32
    %c0_i32_0 = arith.constant 0 : i32
    %c0_i32_1 = arith.constant 0 : i32
    return %c0_i32, %c0_i32_0 : i32, i32
  }
  func.func @transform_2(%arg0: i32) -> (i32, i32) {
    %c0_i32 = arith.constant 0 : i32
    %c0_i32_0 = arith.constant 0 : i32
    %c0_i32_1 = arith.constant 0 : i32
    return %c0_i32, %c0_i32_0 : i32, i32
  }
  func.func @transform_3(%arg0: i32) -> (i32, i32) {
    %c0_i32 = arith.constant 0 : i32
    %c0_i32_0 = arith.constant 0 : i32
    %c0_i32_1 = arith.constant 0 : i32
    return %c0_i32, %c0_i32_0 : i32, i32
  }
  func.func @transform_4(%arg0: i32) -> (i32, i32) {
    %c0_i32 = arith.constant 0 : i32
    %c0_i32_0 = arith.constant 0 : i32
    %c0_i32_1 = arith.constant 0 : i32
    return %c0_i32, %c0_i32_0 : i32, i32
  }
  func.func @transform_5(%arg0: i32) -> (i32, i32) {
    %c0_i32 = arith.constant 0 : i32
    %c0_i32_0 = arith.constant 0 : i32
    %c0_i32_1 = arith.constant 0 : i32
    return %c0_i32, %c0_i32_0 : i32, i32
  }
  func.func @transform_6(%arg0: i32) -> (i32, i32) {
    %c0_i32 = arith.constant 0 : i32
    %c0_i32_0 = arith.constant 0 : i32
    %c0_i32_1 = arith.constant 0 : i32
    return %c0_i32, %c0_i32_0 : i32, i32
  }
  func.func @transform_7(%arg0: i32) -> (i32, i32) {
    %c0_i32 = arith.constant 0 : i32
    %c0_i32_0 = arith.constant 0 : i32
    return %arg0, %c0_i32 : i32, i32
  }
}

</mosaic_0001>

<bundles_post_ra>
// kernel: neural_network_a_forward.1
= control target key start
LH: loop header
LB: loop body
LE: loop exit
PB: predicated region body
PF: predicated region fallthrough
CT: control target
= control target key end

     0   :  { %12 = vsyncpa [#allocation3], 0  ;;  %s889_s0 = inlined_call_operand.vmem [shape: f32[8,256], index: 0, kind: input, shape index: {}]   ;;  %s890_s1 = inlined_call_operand.vmem [shape: bf16[256,128], index: 1, kind: input, shape index: {}]   ;;  %s891_s2 = inlined_call_operand.vmem [shape: f32[1,128], index: 2, kind: input, shape index: {}]   ;;  %s892_s3 = inlined_call_operand.hbm [shape: bf16[128,128], index: 3, kind: input, shape index: {}]   ;;  %s893_s4 = inlined_call_operand.vmem [shape: f32[1,128], index: 4, kind: input, shape index: {}]   ;;  %s894_s5 = inlined_call_operand.hbm [shape: bf16[128,128], index: 5, kind: input, shape index: {}]   ;;  %s895_s6 = inlined_call_operand.vmem [shape: f32[1,128], index: 6, kind: input, shape index: {}]   ;;  %s896_s7 = inlined_call_operand.hbm [shape: f32[8,128], index: 7, kind: output, shape index: {}]  }
   0x1   :  { %13 = vsyncpa [#allocation6], 0 }
   0x2   :  { %14 = vsyncpa [#allocation4], 0  ;;  %s723_s24 = smov [#allocation2]   ;;  %s651_s28 = scalar_lea.hbm %s892_s3, 1024 }
   0x3   :  { %s26_s25 = sshll.u32 %s723_s24, 4  ;;  %p652_p0 = scmp.ne.s32.totalorder %s892_s3, %s651_s28  ;;  %s27_s25 = int_to_ptr.vmem [resolvable:$true] %s26_s25 }
   0x4   :  { %p655_p1 = scmp.lt.u32.totalorder %s651_s28, %s892_s3 }
   0x6   :  { %p657_p2 = pnand %p655_p1, %p652_p0 }
   0x8   :  { %660 = shalt.err (!%p657_p2)
}
   0x9   :  { %s661_s10 = scalar_lea.vmem %s27_s25, 1024  ;;  %p666_p4 = scmp.lt.s32.totalorder %s27_s25, %s27_s25 }
   0xa   :  { %p662_p3 = scmp.ne.s32.totalorder %s27_s25, %s661_s10  ;;  %p667_p5 = scmp.lt.s32.totalorder %s661_s10, %s661_s10 }
   0xc   :  { %p668_p6 = por %p667_p5, %p666_p4 }
   0xe   :  { %p669_p7 = pnand %p668_p6, %p662_p3 }
  0x10   :  { %672 = shalt.err (!%p669_p7)
}
  0x11   :  { %s724_s11 = smov 64   ;;  %s725_s12 = smov 4  }
  0x12   :  { %32 = dma.hbm_to_vmem [thread:$0]  %s892_s3, 1024, %s27_s25, [#allocation3], %s724_s11, %s724_s11, %s725_s12  }
  0x13   :  { %s726_s15 = smov [#allocation5]   ;;  %s673_s19 = scalar_lea.hbm %s894_s5, 1024 }
  0x14   :  { %s40_s16 = sshll.u32 %s726_s15, 4  ;;  %p674_p8 = scmp.ne.s32.totalorder %s894_s5, %s673_s19  ;;  %s41_s16 = int_to_ptr.vmem [resolvable:$true] %s40_s16 }
  0x15   :  { %p677_p9 = scmp.lt.u32.totalorder %s673_s19, %s894_s5 }
  0x17   :  { %p679_p10 = pnand %p677_p9, %p674_p8 }
  0x19   :  { %682 = shalt.err (!%p679_p10)
}
  0x1a   :  { %s683_s24 = scalar_lea.vmem %s41_s16, 1024  ;;  %p688_p12 = scmp.lt.s32.totalorder %s41_s16, %s41_s16 }
  0x1b   :  { %p684_p11 = scmp.ne.s32.totalorder %s41_s16, %s683_s24  ;;  %p689_p13 = scmp.lt.s32.totalorder %s683_s24, %s683_s24 }
  0x1d   :  { %p690_p0 = por %p689_p13, %p688_p12 }
  0x1f   :  { %p691_p1 = pnand %p690_p0, %p684_p11 }
  0x21   :  { %694 = shalt.err (!%p691_p1)
}
  0x22   :  { %46 = dma.hbm_to_vmem [thread:$0]  %s894_s5, 1024, %s41_s16, [#allocation6], %s724_s11, %s724_s11, %s725_s12  }
  0x23   :  { %717 = dma.done.wait [#allocation3], 1024  }
  0x24   :  { %718 = vsyncadd [#allocation3], 4294966272 }
  0x25   :  { %719 = dma.done.wait [#allocation6], 1024  }
  0x26   :  { %720 = vsyncadd [#allocation6], 4294966272  ;;  %v727_v0 = vmov 0.0   ;;  %v615_v1 = vld [vmem:[%s890_s1 + $0x40] sm:$0xff]   ;;  %v617_v3 = vld [vmem:[%s890_s1 + $0x48] sm:$0xff]   ;;  %vm728_vm0 = vmmov 0   ;;  %v461_v54 = vlaneseq }
  0x27   :  { %568 = vmatprep.subr.bf16.mxu1 %v727_v0  ;;  %v616_v2 = vld [vmem:[%s890_s1] sm:$0xff]   ;;  %528 = vmatprep.subr.bf16.mxu0 %v615_v1  ;;  %v618_v4 = vld [vmem:[%s890_s1 + $0x8] sm:$0xff]   ;;  %v619_v5 = vld [vmem:[%s890_s1 + $0x50] sm:$0xff]  }
  0x28   :  { %529 = vmatpush3.bf16.msra.mxu0 %v616_v2  ;;  %v620_v6 = vld [vmem:[%s890_s1 + $0x10] sm:$0xff]   ;;  %v621_v7 = vld [vmem:[%s890_s1 + $0x58] sm:$0xff]   ;;  %v623_v9 = vld [vmem:[%s890_s1 + $0x60] sm:$0xff]   ;;  %584 = vmatprep.mubr.msk.bf16.mxu1 %vm728_vm0, %v727_v0  ;;  %v462_v55 = vand.u32 127, %v461_v54 }
  0x29   :  { %530 = vmatprep.subr.bf16.mxu0 %v617_v3  ;;  %v622_v8 = vld [vmem:[%s890_s1 + $0x18] sm:$0xff]   ;;  %v624_v10 = vld [vmem:[%s890_s1 + $0x20] sm:$0xff]   ;;  %v625_v11 = vld [vmem:[%s890_s1 + $0x68] sm:$0xff]  }
  0x2a   :  { %v57_v12 = vld [vmem:[%s889_s0 + $0x8] sm:$0xff]  ;;  %v631_v14 = vld [vmem:[#allocation2] sm:$0xff]   ;;  %v627_v16 = vld [vmem:[%s890_s1 + $0x70] sm:$0xff]   ;;  %vm463_vm1 = vcmp.lt.s32.totalorder %v462_v55, 10 }
  0x2b   :  { %v59_v13 = vpack.c.bf16 %v57_v12, %v57_v12  ;;  %v626_v15 = vld [vmem:[%s890_s1 + $0x28] sm:$0xff]   ;;  %569 = vmatpush3.bf16.msra.mxu1 %v631_v14  ;;  %v628_v18 = vld [vmem:[%s890_s1 + $0x30] sm:$0xff]   ;;  %v629_v19 = vld [vmem:[%s890_s1 + $0x78] sm:$0xff]  }
  0x2c   :  { %531 = vmatpush3.bf16.msra.mxu0 %v618_v4  ;;  %v632_v17 = vld [vmem:[#allocation2 + $0x8] sm:$0xff]   ;;  %570 = vmatprep.subr.bf16.mxu1 %v727_v0  ;;  %v633_v20 = vld [vmem:[#allocation2 + $0x10] sm:$0xff]   ;;  %v630_v21 = vld [vmem:[%s890_s1 + $0x38] sm:$0xff]  }
  0x2d   :  { %532 = vmatprep.subr.bf16.mxu0 %v619_v5  ;;  %227 = vmatprep.mubr.bf16.mxu0 %v59_v13  ;;  %v56_v22 = vld [vmem:[%s889_s0] sm:$0xff]  ;;  %v634_v23 = vld [vmem:[#allocation2 + $0x18] sm:$0xff]   ;;  %v636_v26 = vld [vmem:[#allocation2 + $0x28] sm:$0xff]  }
  0x2e   :  { %v58_v24 = vpack.c.bf16 %v56_v22, %v56_v22  ;;  %v635_v25 = vld [vmem:[#allocation2 + $0x20] sm:$0xff]   ;;  %v637_v27 = vld [vmem:[#allocation2 + $0x30] sm:$0xff]   ;;  %v638_v28 = vld [vmem:[#allocation2 + $0x38] sm:$0xff]  }
  0x2f   :  { %571 = vmatpush3.bf16.msra.mxu1 %v632_v17  ;;  %v639_v29 = vld [vmem:[#allocation5] sm:$0xff]   ;;  %v640_v30 = vld [vmem:[#allocation5 + $0x8] sm:$0xff]   ;;  %v641_v31 = vld [vmem:[#allocation5 + $0x10] sm:$0xff]  }
  0x30   :  { %533 = vmatpush3.bf16.msra.mxu0 %v620_v6  ;;  %572 = vmatprep.subr.bf16.mxu1 %v727_v0  ;;  %v642_v32 = vld [vmem:[#allocation5 + $0x18] sm:$0xff]   ;;  %v643_v33 = vld [vmem:[#allocation5 + $0x20] sm:$0xff]   ;;  %v644_v34 = vld [vmem:[#allocation5 + $0x28] sm:$0xff]  }
  0x31   :  { %534 = vmatprep.subr.bf16.mxu0 %v621_v7  ;;  %v493_v36 = vld [vmem:[%s891_s2] ss:$0 sm:$0xff]  ;;  %v645_v44 = vld [vmem:[#allocation5 + $0x30] sm:$0xff]   ;;  %v646_v45 = vld [vmem:[#allocation5 + $0x38] sm:$0xff]  }
  0x32   :  { %v510_v46 = vld [vmem:[%s893_s4] ss:$0 sm:$0xff]  ;;  %s729_s4 = smov [#allocation7]  }
  0x33   :  { %573 = vmatpush3.bf16.msra.mxu1 %v633_v20  ;;  %v519_v56 = vld [vmem:[%s895_s6] ss:$0 sm:$0xff]  ;;  %s483_s6 = sshll.u32 %s729_s4, 4  ;;  %s484_s6 = int_to_ptr.vmem [resolvable:$true] %s483_s6 }
  0x34   :  { %535 = vmatpush3.bf16.msra.mxu0 %v622_v8  ;;  %574 = vmatprep.subr.bf16.mxu1 %v727_v0  ;;  %s695_s16 = scalar_lea.vmem %s484_s6, 128  ;;  %p700_p3 = scmp.lt.s32.totalorder %s484_s6, %s484_s6 }
  0x35   :  { %536 = vmatprep.subr.bf16.mxu0 %v623_v9  ;;  %p696_p2 = scmp.ne.s32.totalorder %s484_s6, %s695_s16  ;;  %p701_p4 = scmp.lt.s32.totalorder %s695_s16, %s695_s16 }
  0x37   :  { %575 = vmatpush3.bf16.msra.mxu1 %v634_v23  ;;  %p702_p5 = por %p701_p4, %p700_p3 }
  0x38   :  { %537 = vmatpush3.bf16.msra.mxu0 %v624_v10  ;;  %576 = vmatprep.subr.bf16.mxu1 %v727_v0 }
  0x39   :  { %538 = vmatprep.subr.bf16.mxu0 %v625_v11  ;;  %p703_p6 = pnand %p702_p5, %p696_p2 }
  0x3b   :  { %577 = vmatpush3.bf16.msra.mxu1 %v635_v25 }
  0x3c   :  { %539 = vmatpush3.bf16.msra.mxu0 %v626_v15  ;;  %578 = vmatprep.subr.bf16.mxu1 %v727_v0 }
  0x3d   :  { %540 = vmatprep.subr.bf16.mxu0 %v627_v16 }
  0x3f   :  { %579 = vmatpush3.bf16.msra.mxu1 %v636_v26 }
  0x40   :  { %541 = vmatpush3.bf16.msra.mxu0 %v628_v18  ;;  %580 = vmatprep.subr.bf16.mxu1 %v727_v0 }
  0x41   :  { %542 = vmatprep.subr.bf16.mxu0 %v629_v19 }
  0x43   :  { %581 = vmatpush3.bf16.msra.mxu1 %v637_v27 }
  0x44   :  { %543 = vmatpush3.bf16.msra.mxu0 %v630_v21  ;;  %582 = vmatprep.subr.bf16.mxu1 %v727_v0 }
  0x45   :  { %588 = vmatprep.subr.bf16.mxu0 %v727_v0 }
  0x47   :  { %228 = vmatmul.mubr.bf16.vlgmr.msra.gmra.mrb[0].mxu0 %v58_v24  ;;  %583 = vmatpush3.bf16.msra.mxu1 %v638_v28 }
  0x48   :  { %604 = vmatprep.mubr.msk.bf16.mxu0 %vm728_vm0, %v727_v0  ;;  %589 = vmatpush3.bf16.msra.mxu0 %v639_v29 }
  0x49   :  { %590 = vmatprep.subr.bf16.mxu0 %v727_v0 }
  0x4c   :  { %591 = vmatpush3.bf16.msra.mxu0 %v640_v30 }
  0x4d   :  { %592 = vmatprep.subr.bf16.mxu0 %v727_v0 }
  0x50   :  { %593 = vmatpush3.bf16.msra.mxu0 %v641_v31 }
  0x51   :  { %594 = vmatprep.subr.bf16.mxu0 %v727_v0 }
  0x54   :  { %595 = vmatpush3.bf16.msra.mxu0 %v642_v32 }
  0x55   :  { %596 = vmatprep.subr.bf16.mxu0 %v727_v0 }
  0x58   :  { %597 = vmatpush3.bf16.msra.mxu0 %v643_v33 }
  0x59   :  { %598 = vmatprep.subr.bf16.mxu0 %v727_v0 }
  0x5c   :  { %599 = vmatpush3.bf16.msra.mxu0 %v644_v34 }
  0x5d   :  { %600 = vmatprep.subr.bf16.mxu0 %v727_v0 }
  0x60   :  { %601 = vmatpush3.bf16.msra.mxu0 %v645_v44 }
  0x61   :  { %602 = vmatprep.subr.bf16.mxu0 %v727_v0 }
  0x64   :  { %603 = vmatpush3.bf16.msra.mxu0 %v646_v45 }
 0x11a   :  { %v544_v35 = vpop.f32.mrb[0].mxu0 }
 0x11b   :  { %v545_v37 = vpop.f32.mrb[1].mxu0 }
 0x11c   :  { %v546_v38 = vadd.f32 %v545_v37, %v544_v35  ;;  %v547_v39 = vpop.f32.mrb[2].mxu0 }
 0x11d   :  { %v548_v40 = vpop.f32.mrb[3].mxu0 }
 0x11e   :  { %v230_v41 = vadd.f32 %v546_v38, %v493_v36 }
 0x120   :  { %v235_v42 = vmax.f32 %v230_v41, 0.0 }
 0x122   :  { %v236_v43 = vpack.c.bf16 %v235_v42, %v235_v42 }
 0x124   :  { %585 = vmatmul.mubr.bf16.vlgmr.msra.gmra.mrb[0].mxu1 %v236_v43 }
 0x1f7   :  { %v342_v47 = vpop.f32.mrb[0].mxu1 }
 0x1f8   :  { %v343_v48 = vadd.f32 %v510_v46, %v342_v47  ;;  %v586_v49 = vpop.f32.mrb[1].mxu1 }
 0x1f9   :  { %v345_v50 = vpop.f32.mrb[2].mxu1 }
 0x1fa   :  { %v348_v51 = vmax.f32 %v343_v48, 0.0  ;;  %v587_v52 = vpop.f32.mrb[3].mxu1 }
 0x1fc   :  { %v349_v53 = vpack.c.bf16 %v348_v51, %v348_v51 }
 0x1fe   :  { %605 = vmatmul.mubr.bf16.vlgmr.msra.gmra.mrb[4].mxu0 %v349_v53 }
 0x2d1   :  { %v455_v57 = vpop.f32.mrb[4].mxu0 }
 0x2d2   :  { %v456_v58 = vadd.f32 %v519_v56, %v455_v57  ;;  %v606_v59 = vpop.f32.mrb[5].mxu0 }
 0x2d3   :  { %v458_v60 = vpop.f32.mrb[6].mxu0 }
 0x2d4   :  { %v607_v61 = vpop.f32.mrb[7].mxu0  ;;  %v464_v62 = vsel %vm463_vm1, %v456_v58, -1e+30 }
 0x2d5   :  { %465 = vmax.xlane.f32.xlu0 %v464_v62 }
 0x362   :  { %v466_v63 = vpop.xlane.xlu0 %465 }
 0x363   :  { %v467_v0 = vsub.f32 %v464_v62, %v466_v63 }
 0x365   :  { %v468_v1 = vmul.f32 1.442695, %v467_v0 }
 0x367   :  { %647 = vpow2.f32 %v468_v1 }
 0x371   :  { %v648_v2 = vpop.eup %647 }
 0x372   :  { %470 = vadd.xlane.f32.xlu0 %v648_v2 }
 0x3ff   :  { %v471_v3 = vpop.xlane.xlu0 %470 }
 0x400   :  { %649 = vlog2.f32 %v471_v3 }
 0x40a   :  { %v650_v4 = vpop.eup %649 }
 0x40b   :  { %v473_v5 = vmul.f32 0.6931472, %v650_v4 }
 0x40d   :  { %v474_v6 = vsub.f32 %v467_v0, %v473_v5 }
 0x40f   :  { %v475_v7 = vsel %vm463_vm1, %v474_v6, 0.0 }
 0x410   :  { %476 = vst [vmem:[#allocation7] sm:$0xff] %v475_v7 }
 0x411   :  { %706 = shalt.err (!%p703_p6)
}
 0x412   :  { %s707_s19 = scalar_lea.hbm %s896_s7, 128 }
 0x413   :  { %p708_p7 = scmp.ne.s32.totalorder %s896_s7, %s707_s19  ;;  %p711_p8 = scmp.lt.u32.totalorder %s707_s19, %s896_s7 }
 0x415   :  { %p713_p9 = pnand %p711_p8, %p708_p7 }
 0x417   :  { %716 = shalt.err (!%p713_p9)
}
 0x418   :  { %486 = dma.vmem_to_hbm [thread:$0]  %s484_s6, 128, %s896_s7, [#allocation4]  }
 0x419   :  { %721 = dma.done.wait [#allocation4], 128  }
 0x41a   :  { %722 = vsyncadd [#allocation4], 4294967168 }
 0x41b   :  { %490 = vsyncpa [#allocation3], 1 }
 0x41c   :  { %491 = vsyncpa [#allocation6], 1 }
 0x41d   :  { %492 = vsyncpa [#allocation4], 1 }

</bundles_post_ra>
